<compile_context>
chip_gen: v5e
topology: v5e:2x2
jax: 0.10.0
libtpu: 0.0.40
codegen_flags: <defaults>
</compile_context>

<pallas_src>
import functools
import math

import jax
import jax.numpy as jnp
from jax.experimental import pallas as pl
from jax.experimental.pallas import tpu as pltpu


# ---------------------------------------------------------------------------
# Kernel 1: fused Q/K/V projection (x streamed once; weights VMEM-resident).
# ---------------------------------------------------------------------------
def _qkv_projection_kernel(x_ref, wq_ref, bq_ref, wk_ref, bk_ref, wv_ref, bv_ref,
                           q_ref, k_ref, v_ref):
    cdt = wq_ref.dtype                              # MXU compute dtype
    x = x_ref[...].astype(cdt)
    # Three separate dots (no column slicing of a fused result -> no relayout
    # when D is not a multiple of 128).  Softmax scale already folded into Wq/bq.
    q = jnp.dot(x, wq_ref[...], preferred_element_type=jnp.float32) + bq_ref[...]
    k = jnp.dot(x, wk_ref[...], preferred_element_type=jnp.float32) + bk_ref[...]
    v = jnp.dot(x, wv_ref[...], preferred_element_type=jnp.float32) + bv_ref[...]
    q_ref[...] = q.astype(q_ref.dtype)
    k_ref[...] = k.astype(k_ref.dtype)
    v_ref[...] = v.astype(v_ref.dtype)


# ---------------------------------------------------------------------------
# Kernel 2: flash-attention over pre-projected Q/K/V (online softmax).
# ---------------------------------------------------------------------------
def _flash_attention_kernel(q_ref, k_ref, v_ref, o_ref, m_sc, l_sc, acc_sc, *,
                            approx_recip):
    ki = pl.program_id(2)

    @pl.when(ki == 0)
    def _init():
        m_sc[...] = jnp.full_like(m_sc, -jnp.inf)
        l_sc[...] = jnp.zeros_like(l_sc)
        acc_sc[...] = jnp.zeros_like(acc_sc)

    # Scores: contract feature axes directly (no k transpose / XLU relayout).
    s = jnp.einsum("bqd,bkd->bqk", q_ref[...], k_ref[...],
                   preferred_element_type=jnp.float32)          # (gb, tq, tkv) f32

    # Online softmax; all elementwise math in f32 (safe on v5e: no bf16 VPU/EUP).
    m_prev = m_sc[...]
    m_new = jnp.maximum(m_prev, jnp.max(s, axis=-1, keepdims=True))
    alpha = jnp.exp(m_prev - m_new)
    p = jnp.exp(s - m_new)
    l_sc[...] = alpha * l_sc[...] + jnp.sum(p, axis=-1, keepdims=True)
    acc_sc[...] = alpha * acc_sc[...] + jnp.einsum(
        "bqk,bkd->bqd", p.astype(v_ref.dtype), v_ref[...],
        preferred_element_type=jnp.float32)
    m_sc[...] = m_new

    @pl.when(ki == pl.num_programs(2) - 1)
    def _finish():
        l = l_sc[...]
        if approx_recip:
            inv_l = pl.reciprocal(l, approx=True)    # EUP slot, ~free (bf16 path)
        else:
            inv_l = 1.0 / l                          # exact divide (f32 path)
        o_ref[...] = (acc_sc[...] * inv_l).astype(o_ref.dtype)


# ---------------------------------------------------------------------------
# Host-side helpers.
# ---------------------------------------------------------------------------
def _vmem_limit_bytes(estimate):
    """VMEM budget: ~75% of the physical per-core VMEM (v7x 64 MiB -> ~48 MiB,
    v5e/v6e 128 MiB -> ~96 MiB), but never more than twice our estimate."""
    try:
        cap = int(pltpu.get_tpu_info().vmem_capacity_bytes)
    except Exception:
        cap = 128 * 1024 * 1024
    ceiling = (cap * 3) // 4
    return int(min(ceiling, max(32 * 1024 * 1024, 2 * int(estimate))))


def _pick_row_tile(rows):
    for cand in (1024, 512, 256, 128, 64, 32, 16, 8):
        if cand <= rows and rows % cand == 0:
            return cand
    return rows


def _const_spec(shape, single_buffer):
    index_map = lambda *_: tuple(0 for _ in shape)
    if single_buffer:
        # Constant index_map -> fetched once; single buffer halves its footprint.
        return pl.BlockSpec(shape, index_map, pipeline_mode=pl.Buffered(1))
    return pl.BlockSpec(shape, index_map)


def _project_qkv(x2, wq_s, bq_s, wk_c, bk_c, wv_c, bv_c, *, compute_dtype):
    rows, D = x2.shape
    Do = wv_c.shape[1]
    tr = _pick_row_tile(rows)
    cbytes = jnp.dtype(compute_dtype).itemsize
    xbytes = x2.dtype.itemsize

    flops = 2 * rows * D * (2 * D + Do)
    bytes_accessed = (rows * D * xbytes
                      + (2 * D * D + D * Do) * cbytes
                      + (2 * D + Do) * 4
                      + rows * (2 * D + Do) * cbytes)
    cost = pl.CostEstimate(flops=int(flops), transcendentals=0,
                           bytes_accessed=int(bytes_accessed))

    vmem_est = (2 * tr * D * xbytes                       # double-buffered x tiles
                + 2 * (2 * D * D + D * Do) * cbytes       # weights (worst case 2x)
                + 2 * (2 * D + Do) * 4                    # biases
                + 2 * tr * (2 * D + Do) * cbytes          # double-buffered outputs
                + tr * (2 * D + Do) * 4)                  # f32 matmul temporaries
    params = pltpu.CompilerParams(
        dimension_semantics=("parallel",),
        vmem_limit_bytes=_vmem_limit_bytes(vmem_est))

    out_shape = (jax.ShapeDtypeStruct((rows, D), compute_dtype),
                 jax.ShapeDtypeStruct((rows, D), compute_dtype),
                 jax.ShapeDtypeStruct((rows, Do), compute_dtype))

    def build(single_buffer):
        in_specs = [
            pl.BlockSpec((tr, D), lambda r: (r, 0)),      # x rows
            _const_spec((D, D), single_buffer),           # Wq (pre-scaled)
            _const_spec((1, D), single_buffer),           # bq (pre-scaled)
            _const_spec((D, D), single_buffer),           # Wk
            _const_spec((1, D), single_buffer),           # bk
            _const_spec((D, Do), single_buffer),          # Wv
            _const_spec((1, Do), single_buffer),          # bv
        ]
        out_specs = [pl.BlockSpec((tr, D), lambda r: (r, 0)),
                     pl.BlockSpec((tr, D), lambda r: (r, 0)),
                     pl.BlockSpec((tr, Do), lambda r: (r, 0))]
        return pl.pallas_call(
            _qkv_projection_kernel,
            out_shape=out_shape,
            grid_spec=pltpu.PrefetchScalarGridSpec(
                num_scalar_prefetch=0, grid=(rows // tr,),
                in_specs=in_specs, out_specs=out_specs),
            compiler_params=params,
            cost_estimate=cost,
        )

    args = (x2, wq_s, bq_s, wk_c, bk_c, wv_c, bv_c)
    try:
        return build(True)(*args)
    except Exception:
        # Fallback for runtimes that reject single-buffered (pl.Buffered(1)) specs.
        return build(False)(*args)


def _flash_attention(q, k, v, out_dtype, *, block_q, block_kv, block_b,
                     approx_recip):
    B, T, D = q.shape
    Do = v.shape[2]

    tq = min(block_q, T)
    if T % tq:
        tq = T       # TODO(synk): pad odd T to a multiple of 8 + mask the tail.
    tkv = min(block_kv, T)
    if T % tkv:
        tkv = T

    # Group batches per grid step when tiles are small (amortize step overhead,
    # pad the MXU M dimension).
    if block_b is None:
        block_b = max(1, 256 // tq)
    gb = max(1, min(block_b, B))
    while B % gb:
        gb -= 1

    cbytes = q.dtype.itemsize
    obytes = jnp.dtype(out_dtype).itemsize
    n_q = T // tq

    flops = 2 * B * T * T * (D + Do)
    bytes_accessed = (B * T * D * cbytes                  # Q read once
                      + n_q * B * T * (D + Do) * cbytes   # K/V re-read per q-tile
                      + B * T * Do * obytes)              # output write
    cost = pl.CostEstimate(flops=int(flops), transcendentals=int(B * T * T),
                           bytes_accessed=int(bytes_accessed))

    vmem_est = (2 * gb * tq * D * cbytes                  # Q blocks (double-buf)
                + 2 * gb * tkv * (D + Do) * cbytes        # K/V blocks (double-buf)
                + 2 * gb * tq * Do * obytes               # output blocks
                + gb * tq * (Do + 2) * 4                  # acc / m / l scratch
                + 2 * gb * tq * tkv * 4)                  # s / p f32 temporaries
    params = pltpu.CompilerParams(
        dimension_semantics=("parallel", "parallel", "arbitrary"),
        vmem_limit_bytes=_vmem_limit_bytes(vmem_est))

    kernel = functools.partial(_flash_attention_kernel, approx_recip=approx_recip)

    return pl.pallas_call(
        kernel,
        out_shape=jax.ShapeDtypeStruct((B, T, Do), out_dtype),
        grid_spec=pltpu.PrefetchScalarGridSpec(
            num_scalar_prefetch=0,
            grid=(B // gb, T // tq, T // tkv),
            in_specs=[
                pl.BlockSpec((gb, tq, D), lambda b, qi, ki: (b, qi, 0)),
                pl.BlockSpec((gb, tkv, D), lambda b, qi, ki: (b, ki, 0)),
                pl.BlockSpec((gb, tkv, Do), lambda b, qi, ki: (b, ki, 0)),
            ],
            out_specs=pl.BlockSpec((gb, tq, Do), lambda b, qi, ki: (b, qi, 0)),
            scratch_shapes=[
                pltpu.VMEM((gb, tq, 1), jnp.float32),     # running max
                pltpu.VMEM((gb, tq, 1), jnp.float32),     # running denominator
                pltpu.VMEM((gb, tq, Do), jnp.float32),    # output accumulator
            ]),
        compiler_params=params,
        cost_estimate=cost,
    )(q, k, v)


def only_attention(x, wq, bq, wk, bk, wv, bv, *,
                   block_q=512, block_kv=1024, block_b=None,
                   compute_dtype=jnp.bfloat16):
    """x: (B, T, D); wq/wk: (D, D); wv: (D, Do); biases: (D,), (D,), (Do,).
    Weights are stored pre-transposed as (in, out) so the kernels compute x@W+b,
    matching nn.Linear's y = x @ W.T + b."""
    B, T, D = x.shape
    Do = wv.shape[1]
    scale = 1.0 / math.sqrt(D)

    # Fold the softmax scale into the Q projection (zero in-kernel cost).
    wq_s = (wq * scale).astype(compute_dtype)
    bq_s = (bq * scale).astype(jnp.float32).reshape(1, D)
    wk_c = wk.astype(compute_dtype)
    bk_c = bk.astype(jnp.float32).reshape(1, D)
    wv_c = wv.astype(compute_dtype)
    bv_c = bv.astype(jnp.float32).reshape(1, Do)

    # Projection pass: x streamed once, Q/K/V written in compute_dtype (halves
    # the HBM traffic the attention kernel re-streams for K/V).
    x2 = x.reshape(B * T, D)
    q2, k2, v2 = _project_qkv(x2, wq_s, bq_s, wk_c, bk_c, wv_c, bv_c,
                              compute_dtype=compute_dtype)
    q = q2.reshape(B, T, D)
    k = k2.reshape(B, T, D)
    v = v2.reshape(B, T, Do)

    approx = bool(jnp.dtype(compute_dtype) == jnp.dtype(jnp.bfloat16))
    return _flash_attention(q, k, v, x.dtype, block_q=block_q, block_kv=block_kv,
                            block_b=block_b, approx_recip=approx)


def _ref_attention(x, wq, bq, wk, bk, wv, bv):
    D = x.shape[-1]
    q = x @ wq + bq
    k = x @ wk + bk
    v = x @ wv + bv
    scores = jnp.einsum("btd,bsd->bts", q, k) / math.sqrt(D)
    w = jax.nn.softmax(scores, axis=-1)
    return jnp.einsum("bts,bsd->btd", w, v)


if __name__ == "__main__":
    key = jax.random.PRNGKey(0)
    B, T, input_dim, output_dim = 2, 8, 32, 32

    ks = jax.random.split(key, 7)
    # deterministic init mimicking nn.Linear default (uniform +/- 1/sqrt(fan_in))
    bound = 1.0 / math.sqrt(input_dim)
    x  = jax.random.normal(ks[0], (B, T, input_dim), dtype=jnp.float32)
    wq = jax.random.uniform(ks[1], (input_dim, input_dim), minval=-bound, maxval=bound,
                            dtype=jnp.float32)
    bq = jax.random.uniform(ks[2], (input_dim,), minval=-bound, maxval=bound,
                            dtype=jnp.float32)
    wk = jax.random.uniform(ks[3], (input_dim, input_dim), minval=-bound, maxval=bound,
                            dtype=jnp.float32)
    bk = jax.random.uniform(ks[4], (input_dim,), minval=-bound, maxval=bound,
                            dtype=jnp.float32)
    wv = jax.random.uniform(ks[5], (input_dim, output_dim), minval=-bound, maxval=bound,
                            dtype=jnp.float32)
    bv = jax.random.uniform(ks[6], (output_dim,), minval=-bound, maxval=bound,
                            dtype=jnp.float32)

    ref = _ref_attention(x, wq, bq, wk, bk, wv, bv)

    # Exact-math path (f32 everywhere, exact final divide).
    out_f32 = only_attention(x, wq, bq, wk, bk, wv, bv, compute_dtype=jnp.float32)
    jax.block_until_ready(out_f32)
    assert out_f32.shape == (B, T, output_dim)
    assert jnp.allclose(out_f32, ref, atol=1e-2, rtol=1e-2), \
        float(jnp.max(jnp.abs(out_f32 - ref)))

    # Production path: bf16 MXU operands + bf16 Q/K/V streaming, f32 softmax/acc.
    out_bf16 = only_attention(x, wq, bq, wk, bk, wv, bv)
    jax.block_until_ready(out_bf16)
    assert out_bf16.shape == (B, T, output_dim)
    assert jnp.allclose(out_bf16, ref, atol=5e-2, rtol=5e-2), \
        float(jnp.max(jnp.abs(out_bf16 - ref)))

    print("KERNEL_OK")
</pallas_src>

<mosaic_0001>
module attributes {stable_mosaic.version = 11 : i64} {
  func.func @_qkv_projection_kernel(%arg0: i32, %arg1: memref<16x32xf32, #tpu.memory_space<vmem>>, %arg2: memref<32x32xf32, #tpu.memory_space<vmem>>, %arg3: memref<1x32xf32, #tpu.memory_space<vmem>>, %arg4: memref<32x32xf32, #tpu.memory_space<vmem>>, %arg5: memref<1x32xf32, #tpu.memory_space<vmem>>, %arg6: memref<32x32xf32, #tpu.memory_space<vmem>>, %arg7: memref<1x32xf32, #tpu.memory_space<vmem>>, %arg8: memref<16x32xf32, #tpu.memory_space<vmem>>, %arg9: memref<16x32xf32, #tpu.memory_space<vmem>>, %arg10: memref<16x32xf32, #tpu.memory_space<vmem>>) attributes {dimension_semantics = [#tpu.dimension_semantics<parallel>], iteration_bounds = array<i64: 1>, scalar_prefetch = 0 : i64, scratch_operands = 0 : i64, tpu.core_type = #tpu.core_type<tc>, window_params = [{transform_indices = @transform_0, window_bounds = array<i64: 16, 32>}, {pipeline_mode = #tpu.pipeline_mode<synchronous>, transform_indices = @transform_1, window_bounds = array<i64: 32, 32>}, {pipeline_mode = #tpu.pipeline_mode<synchronous>, transform_indices = @transform_2, window_bounds = array<i64: 1, 32>}, {pipeline_mode = #tpu.pipeline_mode<synchronous>, transform_indices = @transform_3, window_bounds = array<i64: 32, 32>}, {pipeline_mode = #tpu.pipeline_mode<synchronous>, transform_indices = @transform_4, window_bounds = array<i64: 1, 32>}, {pipeline_mode = #tpu.pipeline_mode<synchronous>, transform_indices = @transform_5, window_bounds = array<i64: 32, 32>}, {pipeline_mode = #tpu.pipeline_mode<synchronous>, transform_indices = @transform_6, window_bounds = array<i64: 1, 32>}, {transform_indices = @transform_7, window_bounds = array<i64: 16, 32>}, {transform_indices = @transform_8, window_bounds = array<i64: 16, 32>}, {transform_indices = @transform_9, window_bounds = array<i64: 16, 32>}]} {
    %c0 = arith.constant 0 : index
    %c0_0 = arith.constant 0 : index
    %0 = vector.load %arg1[%c0, %c0_0] : memref<16x32xf32, #tpu.memory_space<vmem>>, vector<16x32xf32>
    %c0_1 = arith.constant 0 : index
    %c0_2 = arith.constant 0 : index
    %1 = vector.load %arg2[%c0_1, %c0_2] : memref<32x32xf32, #tpu.memory_space<vmem>>, vector<32x32xf32>
    %cst = arith.constant dense<0.000000e+00> : vector<16x32xf32>
    %2 = tpu.matmul %0, %1, %cst {dimension_numbers = #tpu.dot_dimension_numbers<[1], [0], [0], [1], [0, 0, 1, 1], [], []>} : vector<16x32xf32>, vector<32x32xf32>, vector<16x32xf32> -> vector<16x32xf32>
    %c0_3 = arith.constant 0 : index
    %c0_4 = arith.constant 0 : index
    %3 = vector.load %arg3[%c0_3, %c0_4] : memref<1x32xf32, #tpu.memory_space<vmem>>, vector<1x32xf32>
    %4 = vector.broadcast %3 : vector<1x32xf32> to vector<16x32xf32>
    %5 = arith.addf %2, %4 : vector<16x32xf32>
    %c0_5 = arith.constant 0 : index
    %c0_6 = arith.constant 0 : index
    %6 = vector.load %arg4[%c0_5, %c0_6] : memref<32x32xf32, #tpu.memory_space<vmem>>, vector<32x32xf32>
    %cst_7 = arith.constant dense<0.000000e+00> : vector<16x32xf32>
    %7 = tpu.matmul %0, %6, %cst_7 {dimension_numbers = #tpu.dot_dimension_numbers<[1], [0], [0], [1], [0, 0, 1, 1], [], []>} : vector<16x32xf32>, vector<32x32xf32>, vector<16x32xf32> -> vector<16x32xf32>
    %c0_8 = arith.constant 0 : index
    %c0_9 = arith.constant 0 : index
    %8 = vector.load %arg5[%c0_8, %c0_9] : memref<1x32xf32, #tpu.memory_space<vmem>>, vector<1x32xf32>
    %9 = vector.broadcast %8 : vector<1x32xf32> to vector<16x32xf32>
    %10 = arith.addf %7, %9 : vector<16x32xf32>
    %c0_10 = arith.constant 0 : index
    %c0_11 = arith.constant 0 : index
    %11 = vector.load %arg6[%c0_10, %c0_11] : memref<32x32xf32, #tpu.memory_space<vmem>>, vector<32x32xf32>
    %cst_12 = arith.constant dense<0.000000e+00> : vector<16x32xf32>
    %12 = tpu.matmul %0, %11, %cst_12 {dimension_numbers = #tpu.dot_dimension_numbers<[1], [0], [0], [1], [0, 0, 1, 1], [], []>} : vector<16x32xf32>, vector<32x32xf32>, vector<16x32xf32> -> vector<16x32xf32>
    %c0_13 = arith.constant 0 : index
    %c0_14 = arith.constant 0 : index
    %13 = vector.load %arg7[%c0_13, %c0_14] : memref<1x32xf32, #tpu.memory_space<vmem>>, vector<1x32xf32>
    %14 = vector.broadcast %13 : vector<1x32xf32> to vector<16x32xf32>
    %15 = arith.addf %12, %14 : vector<16x32xf32>
    %c0_15 = arith.constant 0 : index
    %c0_16 = arith.constant 0 : index
    %16 = vector.load %arg8[%c0_15, %c0_16] : memref<16x32xf32, #tpu.memory_space<vmem>>, vector<16x32xf32>
    tpu.vector_store %arg8[%c0_15, %c0_16], %5 {strides = array<i32>} : memref<16x32xf32, #tpu.memory_space<vmem>>, vector<16x32xf32>,
    %c0_17 = arith.constant 0 : index
    %c0_18 = arith.constant 0 : index
    %17 = vector.load %arg9[%c0_17, %c0_18] : memref<16x32xf32, #tpu.memory_space<vmem>>, vector<16x32xf32>
    tpu.vector_store %arg9[%c0_17, %c0_18], %10 {strides = array<i32>} : memref<16x32xf32, #tpu.memory_space<vmem>>, vector<16x32xf32>,
    %c0_19 = arith.constant 0 : index
    %c0_20 = arith.constant 0 : index
    %18 = vector.load %arg10[%c0_19, %c0_20] : memref<16x32xf32, #tpu.memory_space<vmem>>, vector<16x32xf32>
    tpu.vector_store %arg10[%c0_19, %c0_20], %15 {strides = array<i32>} : memref<16x32xf32, #tpu.memory_space<vmem>>, vector<16x32xf32>,
    return
  }
  func.func @transform_0(%arg0: i32) -> (i32, i32) {
    %c0_i32 = arith.constant 0 : i32
    %c0_i32_0 = arith.constant 0 : i32
    return %arg0, %c0_i32 : i32, i32
  }
  func.func @transform_1(%arg0: i32) -> (i32, i32) {
    %c0_i32 = arith.constant 0 : i32
    %c0_i32_0 = arith.constant 0 : i32
    %c0_i32_1 = arith.constant 0 : i32
    return %c0_i32, %c0_i32_0 : i32, i32
  }
  func.func @transform_2(%arg0: i32) -> (i32, i32) {
    %c0_i32 = arith.constant 0 : i32
    %c0_i32_0 = arith.constant 0 : i32
    %c0_i32_1 = arith.constant 0 : i32
    return %c0_i32, %c0_i32_0 : i32, i32
  }
  func.func @transform_3(%arg0: i32) -> (i32, i32) {
    %c0_i32 = arith.constant 0 : i32
    %c0_i32_0 = arith.constant 0 : i32
    %c0_i32_1 = arith.constant 0 : i32
    return %c0_i32, %c0_i32_0 : i32, i32
  }
  func.func @transform_4(%arg0: i32) -> (i32, i32) {
    %c0_i32 = arith.constant 0 : i32
    %c0_i32_0 = arith.constant 0 : i32
    %c0_i32_1 = arith.constant 0 : i32
    return %c0_i32, %c0_i32_0 : i32, i32
  }
  func.func @transform_5(%arg0: i32) -> (i32, i32) {
    %c0_i32 = arith.constant 0 : i32
    %c0_i32_0 = arith.constant 0 : i32
    %c0_i32_1 = arith.constant 0 : i32
    return %c0_i32, %c0_i32_0 : i32, i32
  }
  func.func @transform_6(%arg0: i32) -> (i32, i32) {
    %c0_i32 = arith.constant 0 : i32
    %c0_i32_0 = arith.constant 0 : i32
    %c0_i32_1 = arith.constant 0 : i32
    return %c0_i32, %c0_i32_0 : i32, i32
  }
  func.func @transform_7(%arg0: i32) -> (i32, i32) {
    %c0_i32 = arith.constant 0 : i32
    %c0_i32_0 = arith.constant 0 : i32
    return %arg0, %c0_i32 : i32, i32
  }
  func.func @transform_8(%arg0: i32) -> (i32, i32) {
    %c0_i32 = arith.constant 0 : i32
    %c0_i32_0 = arith.constant 0 : i32
    return %arg0, %c0_i32 : i32, i32
  }
  func.func @transform_9(%arg0: i32) -> (i32, i32) {
    %c0_i32 = arith.constant 0 : i32
    %c0_i32_0 = arith.constant 0 : i32
    return %arg0, %c0_i32 : i32, i32
  }
}

module attributes {stable_mosaic.version = 11 : i64} {
  func.func @_qkv_projection_kernel(%arg0: i32, %arg1: memref<16x32xf32, #tpu.memory_space<vmem>>, %arg2: memref<32x32xf32, #tpu.memory_space<vmem>>, %arg3: memref<1x32xf32, #tpu.memory_space<vmem>>, %arg4: memref<32x32xf32, #tpu.memory_space<vmem>>, %arg5: memref<1x32xf32, #tpu.memory_space<vmem>>, %arg6: memref<32x32xf32, #tpu.memory_space<vmem>>, %arg7: memref<1x32xf32, #tpu.memory_space<vmem>>, %arg8: memref<16x32xf32, #tpu.memory_space<vmem>>, %arg9: memref<16x32xf32, #tpu.memory_space<vmem>>, %arg10: memref<16x32xf32, #tpu.memory_space<vmem>>) attributes {dimension_semantics = [#tpu.dimension_semantics<parallel>], iteration_bounds = array<i64: 1>, scalar_prefetch = 0 : i64, scratch_operands = 0 : i64, tpu.core_type = #tpu.core_type<tc>, window_params = [{transform_indices = @transform_0, window_bounds = array<i64: 16, 32>}, {pipeline_mode = #tpu.pipeline_mode<synchronous>, transform_indices = @transform_1, window_bounds = array<i64: 32, 32>}, {pipeline_mode = #tpu.pipeline_mode<synchronous>, transform_indices = @transform_2, window_bounds = array<i64: 1, 32>}, {pipeline_mode = #tpu.pipeline_mode<synchronous>, transform_indices = @transform_3, window_bounds = array<i64: 32, 32>}, {pipeline_mode = #tpu.pipeline_mode<synchronous>, transform_indices = @transform_4, window_bounds = array<i64: 1, 32>}, {pipeline_mode = #tpu.pipeline_mode<synchronous>, transform_indices = @transform_5, window_bounds = array<i64: 32, 32>}, {pipeline_mode = #tpu.pipeline_mode<synchronous>, transform_indices = @transform_6, window_bounds = array<i64: 1, 32>}, {transform_indices = @transform_7, window_bounds = array<i64: 16, 32>}, {transform_indices = @transform_8, window_bounds = array<i64: 16, 32>}, {transform_indices = @transform_9, window_bounds = array<i64: 16, 32>}]} {
    %c0 = arith.constant 0 : index
    %c0_0 = arith.constant 0 : index
    %0 = vector.load %arg1[%c0, %c0_0] : memref<16x32xf32, #tpu.memory_space<vmem>>, vector<16x32xf32>
    %c0_1 = arith.constant 0 : index
    %c0_2 = arith.constant 0 : index
    %1 = vector.load %arg2[%c0_1, %c0_2] : memref<32x32xf32, #tpu.memory_space<vmem>>, vector<32x32xf32>
    %cst = arith.constant dense<0.000000e+00> : vector<16x32xf32>
    %2 = tpu.matmul %0, %1, %cst {dimension_numbers = #tpu.dot_dimension_numbers<[1], [0], [0], [1], [0, 0, 1, 1], [], []>} : vector<16x32xf32>, vector<32x32xf32>, vector<16x32xf32> -> vector<16x32xf32>
    %c0_3 = arith.constant 0 : index
    %c0_4 = arith.constant 0 : index
    %3 = vector.load %arg3[%c0_3, %c0_4] : memref<1x32xf32, #tpu.memory_space<vmem>>, vector<1x32xf32>
    %4 = vector.broadcast %3 : vector<1x32xf32> to vector<16x32xf32>
    %5 = arith.addf %2, %4 : vector<16x32xf32>
    %c0_5 = arith.constant 0 : index
    %c0_6 = arith.constant 0 : index
    %6 = vector.load %arg4[%c0_5, %c0_6] : memref<32x32xf32, #tpu.memory_space<vmem>>, vector<32x32xf32>
    %cst_7 = arith.constant dense<0.000000e+00> : vector<16x32xf32>
    %7 = tpu.matmul %0, %6, %cst_7 {dimension_numbers = #tpu.dot_dimension_numbers<[1], [0], [0], [1], [0, 0, 1, 1], [], []>} : vector<16x32xf32>, vector<32x32xf32>, vector<16x32xf32> -> vector<16x32xf32>
    %c0_8 = arith.constant 0 : index
    %c0_9 = arith.constant 0 : index
    %8 = vector.load %arg5[%c0_8, %c0_9] : memref<1x32xf32, #tpu.memory_space<vmem>>, vector<1x32xf32>
    %9 = vector.broadcast %8 : vector<1x32xf32> to vector<16x32xf32>
    %10 = arith.addf %7, %9 : vector<16x32xf32>
    %c0_10 = arith.constant 0 : index
    %c0_11 = arith.constant 0 : index
    %11 = vector.load %arg6[%c0_10, %c0_11] : memref<32x32xf32, #tpu.memory_space<vmem>>, vector<32x32xf32>
    %cst_12 = arith.constant dense<0.000000e+00> : vector<16x32xf32>
    %12 = tpu.matmul %0, %11, %cst_12 {dimension_numbers = #tpu.dot_dimension_numbers<[1], [0], [0], [1], [0, 0, 1, 1], [], []>} : vector<16x32xf32>, vector<32x32xf32>, vector<16x32xf32> -> vector<16x32xf32>
    %c0_13 = arith.constant 0 : index
    %c0_14 = arith.constant 0 : index
    %13 = vector.load %arg7[%c0_13, %c0_14] : memref<1x32xf32, #tpu.memory_space<vmem>>, vector<1x32xf32>
    %14 = vector.broadcast %13 : vector<1x32xf32> to vector<16x32xf32>
    %15 = arith.addf %12, %14 : vector<16x32xf32>
    %c0_15 = arith.constant 0 : index
    %c0_16 = arith.constant 0 : index
    %16 = vector.load %arg8[%c0_15, %c0_16] : memref<16x32xf32, #tpu.memory_space<vmem>>, vector<16x32xf32>
    tpu.vector_store %arg8[%c0_15, %c0_16], %5 {strides = array<i32>} : memref<16x32xf32, #tpu.memory_space<vmem>>, vector<16x32xf32>,
    %c0_17 = arith.constant 0 : index
    %c0_18 = arith.constant 0 : index
    %17 = vector.load %arg9[%c0_17, %c0_18] : memref<16x32xf32, #tpu.memory_space<vmem>>, vector<16x32xf32>
    tpu.vector_store %arg9[%c0_17, %c0_18], %10 {strides = array<i32>} : memref<16x32xf32, #tpu.memory_space<vmem>>, vector<16x32xf32>,
    %c0_19 = arith.constant 0 : index
    %c0_20 = arith.constant 0 : index
    %18 = vector.load %arg10[%c0_19, %c0_20] : memref<16x32xf32, #tpu.memory_space<vmem>>, vector<16x32xf32>
    tpu.vector_store %arg10[%c0_19, %c0_20], %15 {strides = array<i32>} : memref<16x32xf32, #tpu.memory_space<vmem>>, vector<16x32xf32>,
    return
  }
  func.func @transform_0(%arg0: i32) -> (i32, i32) {
    %c0_i32 = arith.constant 0 : i32
    %c0_i32_0 = arith.constant 0 : i32
    return %arg0, %c0_i32 : i32, i32
  }
  func.func @transform_1(%arg0: i32) -> (i32, i32) {
    %c0_i32 = arith.constant 0 : i32
    %c0_i32_0 = arith.constant 0 : i32
    %c0_i32_1 = arith.constant 0 : i32
    return %c0_i32, %c0_i32_0 : i32, i32
  }
  func.func @transform_2(%arg0: i32) -> (i32, i32) {
    %c0_i32 = arith.constant 0 : i32
    %c0_i32_0 = arith.constant 0 : i32
    %c0_i32_1 = arith.constant 0 : i32
    return %c0_i32, %c0_i32_0 : i32, i32
  }
  func.func @transform_3(%arg0: i32) -> (i32, i32) {
    %c0_i32 = arith.constant 0 : i32
    %c0_i32_0 = arith.constant 0 : i32
    %c0_i32_1 = arith.constant 0 : i32
    return %c0_i32, %c0_i32_0 : i32, i32
  }
  func.func @transform_4(%arg0: i32) -> (i32, i32) {
    %c0_i32 = arith.constant 0 : i32
    %c0_i32_0 = arith.constant 0 : i32
    %c0_i32_1 = arith.constant 0 : i32
    return %c0_i32, %c0_i32_0 : i32, i32
  }
  func.func @transform_5(%arg0: i32) -> (i32, i32) {
    %c0_i32 = arith.constant 0 : i32
    %c0_i32_0 = arith.constant 0 : i32
    %c0_i32_1 = arith.constant 0 : i32
    return %c0_i32, %c0_i32_0 : i32, i32
  }
  func.func @transform_6(%arg0: i32) -> (i32, i32) {
    %c0_i32 = arith.constant 0 : i32
    %c0_i32_0 = arith.constant 0 : i32
    %c0_i32_1 = arith.constant 0 : i32
    return %c0_i32, %c0_i32_0 : i32, i32
  }
  func.func @transform_7(%arg0: i32) -> (i32, i32) {
    %c0_i32 = arith.constant 0 : i32
    %c0_i32_0 = arith.constant 0 : i32
    return %arg0, %c0_i32 : i32, i32
  }
  func.func @transform_8(%arg0: i32) -> (i32, i32) {
    %c0_i32 = arith.constant 0 : i32
    %c0_i32_0 = arith.constant 0 : i32
    return %arg0, %c0_i32 : i32, i32
  }
  func.func @transform_9(%arg0: i32) -> (i32, i32) {
    %c0_i32 = arith.constant 0 : i32
    %c0_i32_0 = arith.constant 0 : i32
    return %arg0, %c0_i32 : i32, i32
  }
}

</mosaic_0001>

<bundles_post_ra>
// kernel: tpu_custom_call.1
= control target key start
LH: loop header
LB: loop body
LE: loop exit
PB: predicated region body
PF: predicated region fallthrough
CT: control target
= control target key end

     0   :  { %15 = vsyncpa [#allocation3], 0  ;;  %s580_s0 = inlined_call_operand.hbm [shape: f32[16,32], index: 0, kind: input, shape index: {}]   ;;  %s581_s1 = inlined_call_operand.hbm [shape: f32[32,32], index: 1, kind: input, shape index: {}]   ;;  %s582_s2 = inlined_call_operand.vmem [shape: f32[1,32], index: 2, kind: input, shape index: {}]   ;;  %s583_s3 = inlined_call_operand.hbm [shape: f32[32,32], index: 3, kind: input, shape index: {}]   ;;  %s584_s4 = inlined_call_operand.vmem [shape: f32[1,32], index: 4, kind: input, shape index: {}]   ;;  %s585_s5 = inlined_call_operand.hbm [shape: f32[32,32], index: 5, kind: input, shape index: {}]   ;;  %s586_s6 = inlined_call_operand.vmem [shape: f32[1,32], index: 6, kind: input, shape index: {}]   ;;  %s587_s7 = inlined_call_operand.hbm [shape: f32[16,32], index: 7, kind: output, shape index: {0}]   ;;  %s588_s8 = inlined_call_operand.hbm [shape: f32[16,32], index: 8, kind: output, shape index: {1}]   ;;  %s589_s9 = inlined_call_operand.hbm [shape: f32[16,32], index: 9, kind: output, shape index: {2}]  }
   0x1   :  { %16 = vsyncpa [#allocation6], 0 }
   0x2   :  { %17 = vsyncpa [#allocation9], 0 }
   0x3   :  { %18 = vsyncpa [#allocation4], 0 }
   0x4   :  { %19 = vsyncpa [#allocation12], 0  ;;  %s37_s11 = sshll.u32 %s581_s1, 4  ;;  %s458_s12 = smov [#allocation5]   ;;  %s38_s11 = int_to_ptr.hbm [resolvable:$true] %s37_s11 }
   0x5   :  { %s39_s13 = sshll.u32 %s458_s12, 4  ;;  %s24_s16 = sshll.u32 %s580_s0, 4  ;;  %s40_s13 = int_to_ptr.vmem [resolvable:$true] %s39_s13  ;;  %s25_s16 = int_to_ptr.hbm [resolvable:$true] %s24_s16 }
   0x6   :  { %s459_s17 = smov 128   ;;  %s460_s18 = smov 8  }
   0x7   :  { %45 = dma.hbm_to_vmem [thread:$0]  %s38_s11, 512, %s40_s13, [#allocation6], %s459_s17, %s459_s17, %s460_s18  }
   0x8   :  { %s461_s19 = smov [#allocation2]   ;;  %s52_s1 = sshll.u32 %s583_s3, 4  ;;  %s53_s1 = int_to_ptr.hbm [resolvable:$true] %s52_s1 }
   0x9   :  { %s26_s20 = sshll.u32 %s461_s19, 4  ;;  %s67_s24 = sshll.u32 %s585_s5, 4  ;;  %s27_s20 = int_to_ptr.vmem [resolvable:$true] %s26_s20  ;;  %s68_s24 = int_to_ptr.hbm [resolvable:$true] %s67_s24 }
   0xa   :  { %32 = dma.hbm_to_vmem [thread:$0]  %s25_s16, 256, %s27_s20, [#allocation3], %s459_s17, %s459_s17, %s460_s18  }
   0xb   :  { %s462_s25 = smov [#allocation7]   ;;  %s463_s27 = smov [#allocation8]  }
   0xc   :  { %s54_s26 = sshll.u32 %s462_s25, 4  ;;  %s69_s3 = sshll.u32 %s463_s27, 4  ;;  %s55_s26 = int_to_ptr.vmem [resolvable:$true] %s54_s26  ;;  %s70_s3 = int_to_ptr.vmem [resolvable:$true] %s69_s3 }
   0xd   :  { %60 = dma.hbm_to_vmem [thread:$0]  %s53_s1, 512, %s55_s26, [#allocation6], %s459_s17, %s459_s17, %s460_s18  }
   0xe   :  { %75 = dma.hbm_to_vmem [thread:$0]  %s68_s24, 512, %s70_s3, [#allocation9], %s459_s17, %s459_s17, %s460_s18  }
   0xf   :  { %448 = dma.done.wait [#allocation3], 256  }
  0x10   :  { %449 = vsyncadd [#allocation3], 4294967040 }
  0x11   :  { %450 = dma.done.wait [#allocation6], 1024  }
  0x12   :  { %451 = vsyncadd [#allocation6], 4294966272 }
  0x13   :  { %452 = dma.done.wait [#allocation9], 512  }
  0x14   :  { %453 = vsyncadd [#allocation9], 4294966784  ;;  %v168_v0 = vld [vmem:[#allocation8 + $0x18] sm:$0xff]  ;;  %v167_v1 = vld [vmem:[#allocation8 + $0x10] sm:$0xff]  ;;  %vm104_vm0 = vcmask 261120   ;;  %s464_s12 = smov [#allocation10]  }
  0x15   :  { %185 = vmatpush.msra.mxu2 %v168_v0  ;;  %v137_v2 = vld [vmem:[#allocation7 + $0x18] sm:$0xff]  ;;  %v136_v3 = vld [vmem:[#allocation7 + $0x10] sm:$0xff]  ;;  %v166_v4 = vld [vmem:[#allocation8 + $0x8] sm:$0xff]  ;;  %s206_s13 = sshll.u32 %s464_s12, 4  ;;  %s465_s16 = smov [#allocation11]   ;;  %s207_s13 = int_to_ptr.vmem [resolvable:$true] %s206_s13 }
  0x16   :  { %154 = vmatpush.msra.mxu1 %v137_v2  ;;  %v99_v5 = vld [vmem:[#allocation5 + $0x18] sm:$0xff]  ;;  %v165_v6 = vld [vmem:[#allocation8] sm:$0xff]  ;;  %v135_v7 = vld [vmem:[#allocation7 + $0x8] sm:$0xff]  ;;  %s219_s19 = sshll.u32 %s465_s16, 4  ;;  %s221_s21 = sshll.u32 %s588_s8, 4  ;;  %s220_s19 = int_to_ptr.vmem [resolvable:$true] %s219_s19  ;;  %s222_s21 = int_to_ptr.hbm [resolvable:$true] %s221_s21 }
  0x17   :  { %186 = vmatpush.msra.mxu2 %v167_v1  ;;  %264 = vmatpush.msra.mxu3 %v99_v5  ;;  %v98_v8 = vld [vmem:[#allocation5 + $0x10] sm:$0xff]  ;;  %v97_v10 = vld [vmem:[#allocation5 + $0x8] sm:$0xff]  ;;  %v134_v11 = vld [vmem:[#allocation7] sm:$0xff]  ;;  %s234_s8 = sshll.u32 %s589_s9, 4  ;;  %s235_s8 = int_to_ptr.hbm [resolvable:$true] %s234_s8 }
  0x18   :  { %155 = vmatpush.msra.mxu1 %v136_v3  ;;  %v94_v9 = vld [vmem:[#allocation2] sm:$0xff]  ;;  %123 = vmatpush.msra.mxu0 %v99_v5  ;;  %v96_v12 = vld [vmem:[#allocation5] sm:$0xff]  ;;  %v95_v13 = vld [vmem:[#allocation2 + $0x8] sm:$0xff] }
  0x19   :  { %187 = vmatpush.msra.mxu2 %v166_v4  ;;  %265 = vmatpush.msra.mxu3 %v98_v8  ;;  %v277_v14 = vld [vmem:[%s584_s4] ss:$0 sm:$0xff]  ;;  %s208_s4 = sshll.u32 %s587_s7, 4  ;;  %s209_s4 = int_to_ptr.hbm [resolvable:$true] %s208_s4 }
  0x1a   :  { %156 = vmatpush.msra.mxu1 %v135_v7  ;;  %124 = vmatpush.msra.mxu0 %v98_v8  ;;  %v279_v17 = vld [vmem:[%s582_s2] ss:$0 sm:$0xff] }
  0x1b   :  { %188 = vmatpush.msra.mxu2 %v165_v6  ;;  %266 = vmatpush.msra.mxu3 %v97_v10  ;;  %v278_v18 = vld [vmem:[%s586_s6] ss:$0 sm:$0xff]  ;;  %s466_s6 = smov [#allocation13]  }
  0x1c   :  { %262 = vmatmul.msk.f32.vlgmr.msra.gmra.mxu2 %vm104_vm0, %v94_v9  ;;  %157 = vmatpush.msra.mxu1 %v134_v11  ;;  %s232_s7 = sshll.u32 %s466_s6, 4  ;;  %s233_s7 = int_to_ptr.vmem [resolvable:$true] %s232_s7 }
  0x1d   :  { %260 = vmatmul.msk.f32.vlgmr.msra.gmra.mxu1 %vm104_vm0, %v94_v9  ;;  %267 = vmatpush.msra.mxu3 %v96_v12 }
  0x1e   :  { %259 = vmatmul.msk.f32.vlgmr.msra.gmra.mxu3 %vm104_vm0, %v95_v13  ;;  %125 = vmatpush.msra.mxu0 %v97_v10 }
  0x20   :  { %126 = vmatpush.msra.mxu0 %v96_v12 }
  0x21   :  { %258 = vmatmul.msk.f32.vlgmr.msra.gmra.mxu0 %vm104_vm0, %v94_v9 }
  0x24   :  { %263 = vmatmul.msk.f32.gmra.mxu2 %vm104_vm0, %v95_v13 }
  0x25   :  { %261 = vmatmul.msk.f32.gmra.mxu1 %vm104_vm0, %v95_v13 }
  0x9a   :  { %v159_v15 = vpop.f32.mrf.mxu1 }
  0x9b   :  { %v160_v16 = vadd.f32 %v277_v14, %v159_v15 }
  0x9d   :  { %198 = vst.msk [vmem:[#allocation11] sm:$0xff] %vm104_vm0, %v160_v16 }
  0x9e   :  { %v128_v19 = vpop.f32.mrf.mxu0 }
  0x9f   :  { %v190_v20 = vpop.f32.mrf.mxu2  ;;  %v129_v21 = vadd.f32 %v279_v17, %v128_v19 }
  0xa0   :  { %v191_v22 = vadd.f32 %v278_v18, %v190_v20 }
  0xa1   :  { %196 = vst.msk [vmem:[#allocation10] sm:$0xff] %vm104_vm0, %v129_v21  ;;  %v131_v23 = vpop.f32.mrf.mxu3 }
  0xa2   :  { %200 = vst.msk [vmem:[#allocation13] sm:$0xff] %vm104_vm0, %v191_v22  ;;  %v162_v24 = vpop.f32.mrf.mxu1  ;;  %v132_v25 = vadd.f32 %v279_v17, %v131_v23 }
  0xa3   :  { %v163_v26 = vadd.f32 %v277_v14, %v162_v24 }
  0xa4   :  { %197 = vst.msk [vmem:[#allocation10 + $0x8] sm:$0xff] %vm104_vm0, %v132_v25 }
  0xa5   :  { %199 = vst.msk [vmem:[#allocation11 + $0x8] sm:$0xff] %vm104_vm0, %v163_v26  ;;  %214 = dma.vmem_to_hbm [thread:$0]  %s207_s13, 256, %s209_s4, [#allocation4], %s459_s17, %s459_s17, %s460_s18  }
  0xa6   :  { %227 = dma.vmem_to_hbm [thread:$0]  %s220_s19, 256, %s222_s21, [#allocation12], %s459_s17, %s459_s17, %s460_s18  }
  0xa7   :  { %v193_v27 = vpop.f32.mrf.mxu2 }
  0xa8   :  { %v194_v28 = vadd.f32 %v278_v18, %v193_v27 }
  0xaa   :  { %201 = vst.msk [vmem:[#allocation13 + $0x8] sm:$0xff] %vm104_vm0, %v194_v28 }
  0xab   :  { %240 = dma.vmem_to_hbm [thread:$0]  %s233_s7, 256, %s235_s8, [#allocation12], %s459_s17, %s459_s17, %s460_s18  }
  0xac   :  { %454 = dma.done.wait [#allocation4], 256  }
  0xad   :  { %455 = vsyncadd [#allocation4], 4294967040 }
  0xae   :  { %456 = dma.done.wait [#allocation12], 512  }
  0xaf   :  { %457 = vsyncadd [#allocation12], 4294966784 }
  0xb0   :  { %253 = vsyncpa [#allocation3], 1 }
  0xb1   :  { %254 = vsyncpa [#allocation6], 1 }
  0xb2   :  { %255 = vsyncpa [#allocation9], 1 }
  0xb3   :  { %256 = vsyncpa [#allocation4], 1 }
  0xb4   :  { %257 = vsyncpa [#allocation12], 1 }

// kernel: tpu_custom_call.1
= control target key start
LH: loop header
LB: loop body
LE: loop exit
PB: predicated region body
PF: predicated region fallthrough
CT: control target
= control target key end

     0   :  { %15 = vsyncpa [#allocation3], 0  ;;  %s580_s0 = inlined_call_operand.hbm [shape: f32[16,32], index: 0, kind: input, shape index: {}]   ;;  %s581_s1 = inlined_call_operand.hbm [shape: f32[32,32], index: 1, kind: input, shape index: {}]   ;;  %s582_s2 = inlined_call_operand.vmem [shape: f32[1,32], index: 2, kind: input, shape index: {}]   ;;  %s583_s3 = inlined_call_operand.hbm [shape: f32[32,32], index: 3, kind: input, shape index: {}]   ;;  %s584_s4 = inlined_call_operand.vmem [shape: f32[1,32], index: 4, kind: input, shape index: {}]   ;;  %s585_s5 = inlined_call_operand.hbm [shape: f32[32,32], index: 5, kind: input, shape index: {}]   ;;  %s586_s6 = inlined_call_operand.vmem [shape: f32[1,32], index: 6, kind: input, shape index: {}]   ;;  %s587_s7 = inlined_call_operand.hbm [shape: f32[16,32], index: 7, kind: output, shape index: {0}]   ;;  %s588_s8 = inlined_call_operand.hbm [shape: f32[16,32], index: 8, kind: output, shape index: {1}]   ;;  %s589_s9 = inlined_call_operand.hbm [shape: f32[16,32], index: 9, kind: output, shape index: {2}]  }
   0x1   :  { %16 = vsyncpa [#allocation6], 0 }
   0x2   :  { %17 = vsyncpa [#allocation9], 0 }
   0x3   :  { %18 = vsyncpa [#allocation4], 0 }
   0x4   :  { %19 = vsyncpa [#allocation12], 0  ;;  %s37_s11 = sshll.u32 %s581_s1, 4  ;;  %s458_s12 = smov [#allocation5]   ;;  %s38_s11 = int_to_ptr.hbm [resolvable:$true] %s37_s11 }
   0x5   :  { %s39_s13 = sshll.u32 %s458_s12, 4  ;;  %s24_s16 = sshll.u32 %s580_s0, 4  ;;  %s40_s13 = int_to_ptr.vmem [resolvable:$true] %s39_s13  ;;  %s25_s16 = int_to_ptr.hbm [resolvable:$true] %s24_s16 }
   0x6   :  { %s459_s17 = smov 128   ;;  %s460_s18 = smov 8  }
   0x7   :  { %45 = dma.hbm_to_vmem [thread:$0]  %s38_s11, 512, %s40_s13, [#allocation6], %s459_s17, %s459_s17, %s460_s18  }
   0x8   :  { %s461_s19 = smov [#allocation2]   ;;  %s52_s1 = sshll.u32 %s583_s3, 4  ;;  %s53_s1 = int_to_ptr.hbm [resolvable:$true] %s52_s1 }
   0x9   :  { %s26_s20 = sshll.u32 %s461_s19, 4  ;;  %s67_s24 = sshll.u32 %s585_s5, 4  ;;  %s27_s20 = int_to_ptr.vmem [resolvable:$true] %s26_s20  ;;  %s68_s24 = int_to_ptr.hbm [resolvable:$true] %s67_s24 }
   0xa   :  { %32 = dma.hbm_to_vmem [thread:$0]  %s25_s16, 256, %s27_s20, [#allocation3], %s459_s17, %s459_s17, %s460_s18  }
   0xb   :  { %s462_s25 = smov [#allocation7]   ;;  %s463_s27 = smov [#allocation8]  }
   0xc   :  { %s54_s26 = sshll.u32 %s462_s25, 4  ;;  %s69_s3 = sshll.u32 %s463_s27, 4  ;;  %s55_s26 = int_to_ptr.vmem [resolvable:$true] %s54_s26  ;;  %s70_s3 = int_to_ptr.vmem [resolvable:$true] %s69_s3 }
   0xd   :  { %60 = dma.hbm_to_vmem [thread:$0]  %s53_s1, 512, %s55_s26, [#allocation6], %s459_s17, %s459_s17, %s460_s18  }
   0xe   :  { %75 = dma.hbm_to_vmem [thread:$0]  %s68_s24, 512, %s70_s3, [#allocation9], %s459_s17, %s459_s17, %s460_s18  }
   0xf   :  { %448 = dma.done.wait [#allocation3], 256  }
  0x10   :  { %449 = vsyncadd [#allocation3], 4294967040 }
  0x11   :  { %450 = dma.done.wait [#allocation6], 1024  }
  0x12   :  { %451 = vsyncadd [#allocation6], 4294966272 }
  0x13   :  { %452 = dma.done.wait [#allocation9], 512  }
  0x14   :  { %453 = vsyncadd [#allocation9], 4294966784  ;;  %v168_v0 = vld [vmem:[#allocation8 + $0x18] sm:$0xff]  ;;  %v167_v1 = vld [vmem:[#allocation8 + $0x10] sm:$0xff]  ;;  %vm104_vm0 = vcmask 261120   ;;  %s464_s12 = smov [#allocation10]  }
  0x15   :  { %185 = vmatpush.msra.mxu2 %v168_v0  ;;  %v137_v2 = vld [vmem:[#allocation7 + $0x18] sm:$0xff]  ;;  %v136_v3 = vld [vmem:[#allocation7 + $0x10] sm:$0xff]  ;;  %v166_v4 = vld [vmem:[#allocation8 + $0x8] sm:$0xff]  ;;  %s206_s13 = sshll.u32 %s464_s12, 4  ;;  %s465_s16 = smov [#allocation11]   ;;  %s207_s13 = int_to_ptr.vmem [resolvable:$true] %s206_s13 }
  0x16   :  { %154 = vmatpush.msra.mxu1 %v137_v2  ;;  %v99_v5 = vld [vmem:[#allocation5 + $0x18] sm:$0xff]  ;;  %v165_v6 = vld [vmem:[#allocation8] sm:$0xff]  ;;  %v135_v7 = vld [vmem:[#allocation7 + $0x8] sm:$0xff]  ;;  %s219_s19 = sshll.u32 %s465_s16, 4  ;;  %s221_s21 = sshll.u32 %s588_s8, 4  ;;  %s220_s19 = int_to_ptr.vmem [resolvable:$true] %s219_s19  ;;  %s222_s21 = int_to_ptr.hbm [resolvable:$true] %s221_s21 }
  0x17   :  { %186 = vmatpush.msra.mxu2 %v167_v1  ;;  %264 = vmatpush.msra.mxu3 %v99_v5  ;;  %v98_v8 = vld [vmem:[#allocation5 + $0x10] sm:$0xff]  ;;  %v97_v10 = vld [vmem:[#allocation5 + $0x8] sm:$0xff]  ;;  %v134_v11 = vld [vmem:[#allocation7] sm:$0xff]  ;;  %s234_s8 = sshll.u32 %s589_s9, 4  ;;  %s235_s8 = int_to_ptr.hbm [resolvable:$true] %s234_s8 }
  0x18   :  { %155 = vmatpush.msra.mxu1 %v136_v3  ;;  %v94_v9 = vld [vmem:[#allocation2] sm:$0xff]  ;;  %123 = vmatpush.msra.mxu0 %v99_v5  ;;  %v96_v12 = vld [vmem:[#allocation5] sm:$0xff]  ;;  %v95_v13 = vld [vmem:[#allocation2 + $0x8] sm:$0xff] }
  0x19   :  { %187 = vmatpush.msra.mxu2 %v166_v4  ;;  %265 = vmatpush.msra.mxu3 %v98_v8  ;;  %v277_v14 = vld [vmem:[%s584_s4] ss:$0 sm:$0xff]  ;;  %s208_s4 = sshll.u32 %s587_s7, 4  ;;  %s209_s4 = int_to_ptr.hbm [resolvable:$true] %s208_s4 }
  0x1a   :  { %156 = vmatpush.msra.mxu1 %v135_v7  ;;  %124 = vmatpush.msra.mxu0 %v98_v8  ;;  %v279_v17 = vld [vmem:[%s582_s2] ss:$0 sm:$0xff] }
  0x1b   :  { %188 = vmatpush.msra.mxu2 %v165_v6  ;;  %266 = vmatpush.msra.mxu3 %v97_v10  ;;  %v278_v18 = vld [vmem:[%s586_s6] ss:$0 sm:$0xff]  ;;  %s466_s6 = smov [#allocation13]  }
  0x1c   :  { %262 = vmatmul.msk.f32.vlgmr.msra.gmra.mxu2 %vm104_vm0, %v94_v9  ;;  %157 = vmatpush.msra.mxu1 %v134_v11  ;;  %s232_s7 = sshll.u32 %s466_s6, 4  ;;  %s233_s7 = int_to_ptr.vmem [resolvable:$true] %s232_s7 }
  0x1d   :  { %260 = vmatmul.msk.f32.vlgmr.msra.gmra.mxu1 %vm104_vm0, %v94_v9  ;;  %267 = vmatpush.msra.mxu3 %v96_v12 }
  0x1e   :  { %259 = vmatmul.msk.f32.vlgmr.msra.gmra.mxu3 %vm104_vm0, %v95_v13  ;;  %125 = vmatpush.msra.mxu0 %v97_v10 }
  0x20   :  { %126 = vmatpush.msra.mxu0 %v96_v12 }
  0x21   :  { %258 = vmatmul.msk.f32.vlgmr.msra.gmra.mxu0 %vm104_vm0, %v94_v9 }
  0x24   :  { %263 = vmatmul.msk.f32.gmra.mxu2 %vm104_vm0, %v95_v13 }
  0x25   :  { %261 = vmatmul.msk.f32.gmra.mxu1 %vm104_vm0, %v95_v13 }
  0x9a   :  { %v159_v15 = vpop.f32.mrf.mxu1 }
  0x9b   :  { %v160_v16 = vadd.f32 %v277_v14, %v159_v15 }
  0x9d   :  { %198 = vst.msk [vmem:[#allocation11] sm:$0xff] %vm104_vm0, %v160_v16 }
  0x9e   :  { %v128_v19 = vpop.f32.mrf.mxu0 }
  0x9f   :  { %v190_v20 = vpop.f32.mrf.mxu2  ;;  %v129_v21 = vadd.f32 %v279_v17, %v128_v19 }
  0xa0   :  { %v191_v22 = vadd.f32 %v278_v18, %v190_v20 }
  0xa1   :  { %196 = vst.msk [vmem:[#allocation10] sm:$0xff] %vm104_vm0, %v129_v21  ;;  %v131_v23 = vpop.f32.mrf.mxu3 }
  0xa2   :  { %200 = vst.msk [vmem:[#allocation13] sm:$0xff] %vm104_vm0, %v191_v22  ;;  %v162_v24 = vpop.f32.mrf.mxu1  ;;  %v132_v25 = vadd.f32 %v279_v17, %v131_v23 }
  0xa3   :  { %v163_v26 = vadd.f32 %v277_v14, %v162_v24 }
  0xa4   :  { %197 = vst.msk [vmem:[#allocation10 + $0x8] sm:$0xff] %vm104_vm0, %v132_v25 }
  0xa5   :  { %199 = vst.msk [vmem:[#allocation11 + $0x8] sm:$0xff] %vm104_vm0, %v163_v26  ;;  %214 = dma.vmem_to_hbm [thread:$0]  %s207_s13, 256, %s209_s4, [#allocation4], %s459_s17, %s459_s17, %s460_s18  }
  0xa6   :  { %227 = dma.vmem_to_hbm [thread:$0]  %s220_s19, 256, %s222_s21, [#allocation12], %s459_s17, %s459_s17, %s460_s18  }
  0xa7   :  { %v193_v27 = vpop.f32.mrf.mxu2 }
  0xa8   :  { %v194_v28 = vadd.f32 %v278_v18, %v193_v27 }
  0xaa   :  { %201 = vst.msk [vmem:[#allocation13 + $0x8] sm:$0xff] %vm104_vm0, %v194_v28 }
  0xab   :  { %240 = dma.vmem_to_hbm [thread:$0]  %s233_s7, 256, %s235_s8, [#allocation12], %s459_s17, %s459_s17, %s460_s18  }
  0xac   :  { %454 = dma.done.wait [#allocation4], 256  }
  0xad   :  { %455 = vsyncadd [#allocation4], 4294967040 }
  0xae   :  { %456 = dma.done.wait [#allocation12], 512  }
  0xaf   :  { %457 = vsyncadd [#allocation12], 4294966784 }
  0xb0   :  { %253 = vsyncpa [#allocation3], 1 }
  0xb1   :  { %254 = vsyncpa [#allocation6], 1 }
  0xb2   :  { %255 = vsyncpa [#allocation9], 1 }
  0xb3   :  { %256 = vsyncpa [#allocation4], 1 }
  0xb4   :  { %257 = vsyncpa [#allocation12], 1 }

</bundles_post_ra>
